<compile_context>
chip_gen: v6e
topology: v6e:2x2x1
jax: 0.10.0
libtpu: 0.0.40
codegen_flags: <defaults>
</compile_context>

<pallas_src>
import jax
import jax.numpy as jnp
from jax.experimental import pallas as pl
from jax.experimental.pallas import tpu as pltpu

HIDDEN1, HIDDEN2, HIDDEN3 = 256, 256, 128
BN_EPS = 1e-5
LANE = 128
SUBLANE = 8
MAX_TB = 512   # max batch tile (sized for v7x 64 MiB VMEM / 32 MiB scoped default)


def _round_up(x, m):
    return ((x + m - 1) // m) * m


# ---------------------------------------------------------------------------
# Kernel: one batch tile, whole fused MLP.
# ---------------------------------------------------------------------------
def mlp_kernel(x_ref,
               w1_ref, b1_ref,
               w2_ref, b2_ref,
               w3_ref, b3_ref,
               w4_ref, b4_ref,
               o_ref):
    # Weights are bf16 (pre-cast in the wrapper); accumulate in f32 on the MXU.
    x = x_ref[...].astype(jnp.bfloat16)

    h = jnp.dot(x, w1_ref[...], preferred_element_type=jnp.float32) + b1_ref[...]
    h = jnp.where(h >= 0, h, 0.01 * h)                      # LeakyReLU(0.01)

    h = jnp.dot(h.astype(jnp.bfloat16), w2_ref[...],
                preferred_element_type=jnp.float32) + b2_ref[...]
    h = jnp.where(h >= 0, h, 0.01 * h)                      # LeakyReLU(0.01)

    h = jnp.dot(h.astype(jnp.bfloat16), w3_ref[...],
                preferred_element_type=jnp.float32) + b3_ref[...]
    h = jnp.where(h >= 0, h, 0.02 * h)                      # LeakyReLU(0.02)

    out = jnp.dot(h.astype(jnp.bfloat16), w4_ref[...],
                  preferred_element_type=jnp.float32) + b4_ref[...]
    o_ref[...] = out.astype(o_ref.dtype)


# ---------------------------------------------------------------------------
# Wrapper: BN folding, padding, batch-tiled pallas_call.
# ---------------------------------------------------------------------------
def _fuse_params(params, input_size, num_classes):
    """Fold eval-mode BatchNorm into the next Linear, pad layout, cast to bf16."""
    def bn_affine(g, be, m, v):
        scale = g * jax.lax.rsqrt(v + BN_EPS)     # (1, H)
        shift = be - m * scale                    # (1, H)
        return scale, shift

    s1, t1 = bn_affine(params["g1"], params["be1"], params["m1"], params["v1"])
    s2, t2 = bn_affine(params["g2"], params["be2"], params["m2"], params["v2"])
    s3, t3 = bn_affine(params["g3"], params["be3"], params["m3"], params["v3"])

    w1, b1 = params["w1"], params["b1"]
    # (leaky(x@w1+b1)*s + t) @ w + b  ==  leaky(x@w1+b1) @ (s[:,None]*w) + (t@w + b)
    w2 = s1.reshape(-1, 1) * params["w2"]
    b2 = params["b2"] + t1 @ params["w2"]
    w3 = s2.reshape(-1, 1) * params["w3"]
    b3 = params["b3"] + t2 @ params["w3"]
    w4 = s3.reshape(-1, 1) * params["w4"]
    b4 = params["b4"] + t3 @ params["w4"]

    # Zero-pad layer-1 K dim (exact) and lane-pad the output head to 128.
    kp = _round_up(input_size, LANE)
    w1 = jnp.pad(w1, ((0, kp - input_size), (0, 0)))
    n_pad = _round_up(num_classes, LANE)
    w4 = jnp.pad(w4, ((0, 0), (0, n_pad - num_classes)))
    b4 = jnp.pad(b4, ((0, 0), (0, n_pad - num_classes)))

    bf = jnp.bfloat16
    fused = (w1.astype(bf), b1, w2.astype(bf), b2,
             w3.astype(bf), b3, w4.astype(bf), b4)
    return fused, kp, n_pad


def nn_model_forward(x, params):
    """x: [batch, input_size] float32. params: dict (see init_params)."""
    batch, input_size = x.shape
    num_classes = params["w4"].shape[1]

    fused, kp, n_pad = _fuse_params(params, input_size, num_classes)

    tb = min(MAX_TB, _round_up(batch, SUBLANE))
    batch_p = _round_up(batch, tb)

    xp = x
    if kp != input_size or batch_p != batch:
        xp = jnp.pad(x, ((0, batch_p - batch), (0, kp - input_size)))

    grid = (batch_p // tb,)

    def const_spec(arr):
        # Full-array block, constant index map -> DMA'd once, stays resident.
        return pl.BlockSpec(arr.shape, lambda i: (0, 0))

    in_specs = [pl.BlockSpec((tb, kp), lambda i: (i, 0))]
    in_specs += [const_spec(a) for a in fused]
    out_spec = pl.BlockSpec((tb, n_pad), lambda i: (i, 0))

    out = pl.pallas_call(
        mlp_kernel,
        out_shape=jax.ShapeDtypeStruct((batch_p, n_pad), jnp.float32),
        grid=grid,
        in_specs=in_specs,
        out_specs=out_spec,
        compiler_params=pltpu.CompilerParams(
            dimension_semantics=("parallel",),   # shard batch tiles across TCs (v7x)
        ),
    )(xp, *fused)

    return out[:batch, :num_classes]


# ---------------------------------------------------------------------------
# Deterministic synthetic parameters + f32 reference
# ---------------------------------------------------------------------------
def init_params(key, input_size, num_classes):
    dims = [(input_size, HIDDEN1), (HIDDEN1, HIDDEN2),
            (HIDDEN2, HIDDEN3), (HIDDEN3, num_classes)]
    bn_dims = [HIDDEN1, HIDDEN2, HIDDEN3]
    params = {}
    keys = jax.random.split(key, 16)
    ki = 0
    for i, (fan_in, fan_out) in enumerate(dims, start=1):
        bound = 1.0 / jnp.sqrt(jnp.float32(fan_in))
        params[f"w{i}"] = jax.random.uniform(
            keys[ki], (fan_in, fan_out), jnp.float32, -bound, bound); ki += 1
        params[f"b{i}"] = jax.random.uniform(
            keys[ki], (1, fan_out), jnp.float32, -bound, bound); ki += 1
    for i, h in enumerate(bn_dims, start=1):
        params[f"g{i}"] = 1.0 + 0.1 * jax.random.normal(keys[ki], (1, h), jnp.float32); ki += 1
        params[f"be{i}"] = 0.1 * jax.random.normal(keys[ki], (1, h), jnp.float32); ki += 1
        params[f"m{i}"] = 0.05 * jnp.arange(h, dtype=jnp.float32).reshape(1, h) / h
        params[f"v{i}"] = jnp.ones((1, h), jnp.float32) \
            + 0.01 * jnp.arange(h, dtype=jnp.float32).reshape(1, h) / h
    return params


def _bn_eval(x, gamma, beta, mean, var):
    return (x - mean) * (gamma * jax.lax.rsqrt(var + BN_EPS)) + beta


def reference_forward(x, p):
    h = x @ p["w1"] + p["b1"]
    h = jnp.where(h >= 0, h, 0.01 * h)
    h = _bn_eval(h, p["g1"], p["be1"], p["m1"], p["v1"])
    h = h @ p["w2"] + p["b2"]
    h = jnp.where(h >= 0, h, 0.01 * h)
    h = _bn_eval(h, p["g2"], p["be2"], p["m2"], p["v2"])
    h = h @ p["w3"] + p["b3"]
    h = jnp.where(h >= 0, h, 0.02 * h)
    h = _bn_eval(h, p["g3"], p["be3"], p["m3"], p["v3"])
    return h @ p["w4"] + p["b4"]


if __name__ == "__main__":
    batch = 8
    input_size = 32
    num_classes = 10

    key = jax.random.PRNGKey(0)
    k_x, k_p = jax.random.split(key)
    x = jax.random.normal(k_x, (batch, input_size), jnp.float32)
    params = init_params(k_p, input_size, num_classes)

    fwd = jax.jit(nn_model_forward)
    out = jax.block_until_ready(fwd(x, params))

    ref = reference_forward(x, params)
    assert out.shape == (batch, num_classes)
    # bf16 MXU inputs + BN folding -> compare against the f32 reference with a
    # correspondingly looser (but still tight for bf16) tolerance.
    assert jnp.allclose(out, ref, atol=5e-2, rtol=5e-2), "mismatch vs JAX reference"

    print("KERNEL_OK")
</pallas_src>

<mosaic_0001>
module attributes {stable_mosaic.version = 11 : i64} {
  func.func @mlp_kernel(%arg0: i32, %arg1: memref<8x128xf32, #tpu.memory_space<vmem>>, %arg2: memref<128x256xbf16, #tpu.memory_space<vmem>>, %arg3: memref<1x256xf32, #tpu.memory_space<vmem>>, %arg4: memref<256x256xbf16, #tpu.memory_space<vmem>>, %arg5: memref<1x256xf32, #tpu.memory_space<vmem>>, %arg6: memref<256x128xbf16, #tpu.memory_space<vmem>>, %arg7: memref<1x128xf32, #tpu.memory_space<vmem>>, %arg8: memref<128x128xbf16, #tpu.memory_space<vmem>>, %arg9: memref<1x128xf32, #tpu.memory_space<vmem>>, %arg10: memref<8x128xf32, #tpu.memory_space<vmem>>) attributes {dimension_semantics = [#tpu.dimension_semantics<parallel>], iteration_bounds = array<i64: 1>, scalar_prefetch = 0 : i64, scratch_operands = 0 : i64, tpu.core_type = #tpu.core_type<tc>, window_params = [{transform_indices = @transform_0, window_bounds = array<i64: 8, 128>}, {pipeline_mode = #tpu.pipeline_mode<synchronous>, transform_indices = @transform_1, window_bounds = array<i64: 128, 256>}, {pipeline_mode = #tpu.pipeline_mode<synchronous>, transform_indices = @transform_2, window_bounds = array<i64: 1, 256>}, {pipeline_mode = #tpu.pipeline_mode<synchronous>, transform_indices = @transform_3, window_bounds = array<i64: 256, 256>}, {pipeline_mode = #tpu.pipeline_mode<synchronous>, transform_indices = @transform_4, window_bounds = array<i64: 1, 256>}, {pipeline_mode = #tpu.pipeline_mode<synchronous>, transform_indices = @transform_5, window_bounds = array<i64: 256, 128>}, {pipeline_mode = #tpu.pipeline_mode<synchronous>, transform_indices = @transform_6, window_bounds = array<i64: 1, 128>}, {pipeline_mode = #tpu.pipeline_mode<synchronous>, transform_indices = @transform_7, window_bounds = array<i64: 128, 128>}, {pipeline_mode = #tpu.pipeline_mode<synchronous>, transform_indices = @transform_8, window_bounds = array<i64: 1, 128>}, {transform_indices = @transform_9, window_bounds = array<i64: 8, 128>}]} {
    %c0 = arith.constant 0 : index
    %c0_0 = arith.constant 0 : index
    %0 = vector.load %arg1[%c0, %c0_0] : memref<8x128xf32, #tpu.memory_space<vmem>>, vector<8x128xf32>
    %1 = arith.truncf %0 : vector<8x128xf32> to vector<8x128xbf16>
    %c0_1 = arith.constant 0 : index
    %c0_2 = arith.constant 0 : index
    %2 = vector.load %arg2[%c0_1, %c0_2] : memref<128x256xbf16, #tpu.memory_space<vmem>>, vector<128x256xbf16>
    %cst = arith.constant dense<0.000000e+00> : vector<8x256xf32>
    %3 = tpu.matmul %1, %2, %cst {dimension_numbers = #tpu.dot_dimension_numbers<[1], [0], [0], [1], [0, 0, 1, 1], [], []>} : vector<8x128xbf16>, vector<128x256xbf16>, vector<8x256xf32> -> vector<8x256xf32>
    %c0_3 = arith.constant 0 : index
    %c0_4 = arith.constant 0 : index
    %4 = vector.load %arg3[%c0_3, %c0_4] : memref<1x256xf32, #tpu.memory_space<vmem>>, vector<1x256xf32>
    %5 = vector.broadcast %4 : vector<1x256xf32> to vector<8x256xf32>
    %6 = arith.addf %3, %5 : vector<8x256xf32>
    %cst_5 = arith.constant 0.000000e+00 : f32
    %7 = vector.broadcast %cst_5 : f32 to vector<8x256xf32>
    %8 = arith.cmpf oge, %6, %7 : vector<8x256xf32>
    %cst_6 = arith.constant 0.00999999977 : f32
    %9 = vector.broadcast %cst_6 : f32 to vector<8x256xf32>
    %10 = arith.mulf %9, %6 : vector<8x256xf32>
    %11 = arith.select %8, %6, %10 : vector<8x256xi1>, vector<8x256xf32>
    %12 = arith.truncf %11 : vector<8x256xf32> to vector<8x256xbf16>
    %c0_7 = arith.constant 0 : index
    %c0_8 = arith.constant 0 : index
    %13 = vector.load %arg4[%c0_7, %c0_8] : memref<256x256xbf16, #tpu.memory_space<vmem>>, vector<256x256xbf16>
    %cst_9 = arith.constant dense<0.000000e+00> : vector<8x256xf32>
    %14 = tpu.matmul %12, %13, %cst_9 {dimension_numbers = #tpu.dot_dimension_numbers<[1], [0], [0], [1], [0, 0, 1, 1], [], []>} : vector<8x256xbf16>, vector<256x256xbf16>, vector<8x256xf32> -> vector<8x256xf32>
    %c0_10 = arith.constant 0 : index
    %c0_11 = arith.constant 0 : index
    %15 = vector.load %arg5[%c0_10, %c0_11] : memref<1x256xf32, #tpu.memory_space<vmem>>, vector<1x256xf32>
    %16 = vector.broadcast %15 : vector<1x256xf32> to vector<8x256xf32>
    %17 = arith.addf %14, %16 : vector<8x256xf32>
    %cst_12 = arith.constant 0.000000e+00 : f32
    %18 = vector.broadcast %cst_12 : f32 to vector<8x256xf32>
    %19 = arith.cmpf oge, %17, %18 : vector<8x256xf32>
    %cst_13 = arith.constant 0.00999999977 : f32
    %20 = vector.broadcast %cst_13 : f32 to vector<8x256xf32>
    %21 = arith.mulf %20, %17 : vector<8x256xf32>
    %22 = arith.select %19, %17, %21 : vector<8x256xi1>, vector<8x256xf32>
    %23 = arith.truncf %22 : vector<8x256xf32> to vector<8x256xbf16>
    %c0_14 = arith.constant 0 : index
    %c0_15 = arith.constant 0 : index
    %24 = vector.load %arg6[%c0_14, %c0_15] : memref<256x128xbf16, #tpu.memory_space<vmem>>, vector<256x128xbf16>
    %cst_16 = arith.constant dense<0.000000e+00> : vector<8x128xf32>
    %25 = tpu.matmul %23, %24, %cst_16 {dimension_numbers = #tpu.dot_dimension_numbers<[1], [0], [0], [1], [0, 0, 1, 1], [], []>} : vector<8x256xbf16>, vector<256x128xbf16>, vector<8x128xf32> -> vector<8x128xf32>
    %c0_17 = arith.constant 0 : index
    %c0_18 = arith.constant 0 : index
    %26 = vector.load %arg7[%c0_17, %c0_18] : memref<1x128xf32, #tpu.memory_space<vmem>>, vector<1x128xf32>
    %27 = vector.broadcast %26 : vector<1x128xf32> to vector<8x128xf32>
    %28 = arith.addf %25, %27 : vector<8x128xf32>
    %cst_19 = arith.constant 0.000000e+00 : f32
    %29 = vector.broadcast %cst_19 : f32 to vector<8x128xf32>
    %30 = arith.cmpf oge, %28, %29 : vector<8x128xf32>
    %cst_20 = arith.constant 2.000000e-02 : f32
    %31 = vector.broadcast %cst_20 : f32 to vector<8x128xf32>
    %32 = arith.mulf %31, %28 : vector<8x128xf32>
    %33 = arith.select %30, %28, %32 : vector<8x128xi1>, vector<8x128xf32>
    %34 = arith.truncf %33 : vector<8x128xf32> to vector<8x128xbf16>
    %c0_21 = arith.constant 0 : index
    %c0_22 = arith.constant 0 : index
    %35 = vector.load %arg8[%c0_21, %c0_22] : memref<128x128xbf16, #tpu.memory_space<vmem>>, vector<128x128xbf16>
    %cst_23 = arith.constant dense<0.000000e+00> : vector<8x128xf32>
    %36 = tpu.matmul %34, %35, %cst_23 {dimension_numbers = #tpu.dot_dimension_numbers<[1], [0], [0], [1], [0, 0, 1, 1], [], []>} : vector<8x128xbf16>, vector<128x128xbf16>, vector<8x128xf32> -> vector<8x128xf32>
    %c0_24 = arith.constant 0 : index
    %c0_25 = arith.constant 0 : index
    %37 = vector.load %arg9[%c0_24, %c0_25] : memref<1x128xf32, #tpu.memory_space<vmem>>, vector<1x128xf32>
    %38 = vector.broadcast %37 : vector<1x128xf32> to vector<8x128xf32>
    %39 = arith.addf %36, %38 : vector<8x128xf32>
    %c0_26 = arith.constant 0 : index
    %c0_27 = arith.constant 0 : index
    %40 = vector.load %arg10[%c0_26, %c0_27] : memref<8x128xf32, #tpu.memory_space<vmem>>, vector<8x128xf32>
    tpu.vector_store %arg10[%c0_26, %c0_27], %39 {strides = array<i32>} : memref<8x128xf32, #tpu.memory_space<vmem>>, vector<8x128xf32>,
    return
  }
  func.func @transform_0(%arg0: i32) -> (i32, i32) {
    %c0_i32 = arith.constant 0 : i32
    %c0_i32_0 = arith.constant 0 : i32
    return %arg0, %c0_i32 : i32, i32
  }
  func.func @transform_1(%arg0: i32) -> (i32, i32) {
    %c0_i32 = arith.constant 0 : i32
    %c0_i32_0 = arith.constant 0 : i32
    %c0_i32_1 = arith.constant 0 : i32
    return %c0_i32, %c0_i32_0 : i32, i32
  }
  func.func @transform_2(%arg0: i32) -> (i32, i32) {
    %c0_i32 = arith.constant 0 : i32
    %c0_i32_0 = arith.constant 0 : i32
    %c0_i32_1 = arith.constant 0 : i32
    return %c0_i32, %c0_i32_0 : i32, i32
  }
  func.func @transform_3(%arg0: i32) -> (i32, i32) {
    %c0_i32 = arith.constant 0 : i32
    %c0_i32_0 = arith.constant 0 : i32
    %c0_i32_1 = arith.constant 0 : i32
    return %c0_i32, %c0_i32_0 : i32, i32
  }
  func.func @transform_4(%arg0: i32) -> (i32, i32) {
    %c0_i32 = arith.constant 0 : i32
    %c0_i32_0 = arith.constant 0 : i32
    %c0_i32_1 = arith.constant 0 : i32
    return %c0_i32, %c0_i32_0 : i32, i32
  }
  func.func @transform_5(%arg0: i32) -> (i32, i32) {
    %c0_i32 = arith.constant 0 : i32
    %c0_i32_0 = arith.constant 0 : i32
    %c0_i32_1 = arith.constant 0 : i32
    return %c0_i32, %c0_i32_0 : i32, i32
  }
  func.func @transform_6(%arg0: i32) -> (i32, i32) {
    %c0_i32 = arith.constant 0 : i32
    %c0_i32_0 = arith.constant 0 : i32
    %c0_i32_1 = arith.constant 0 : i32
    return %c0_i32, %c0_i32_0 : i32, i32
  }
  func.func @transform_7(%arg0: i32) -> (i32, i32) {
    %c0_i32 = arith.constant 0 : i32
    %c0_i32_0 = arith.constant 0 : i32
    %c0_i32_1 = arith.constant 0 : i32
    return %c0_i32, %c0_i32_0 : i32, i32
  }
  func.func @transform_8(%arg0: i32) -> (i32, i32) {
    %c0_i32 = arith.constant 0 : i32
    %c0_i32_0 = arith.constant 0 : i32
    %c0_i32_1 = arith.constant 0 : i32
    return %c0_i32, %c0_i32_0 : i32, i32
  }
  func.func @transform_9(%arg0: i32) -> (i32, i32) {
    %c0_i32 = arith.constant 0 : i32
    %c0_i32_0 = arith.constant 0 : i32
    return %arg0, %c0_i32 : i32, i32
  }
}

</mosaic_0001>

<bundles_post_ra>
// kernel: nn_model_forward.1
= control target key start
LH: loop header
LB: loop body
LE: loop exit
PB: predicated region body
PF: predicated region fallthrough
CT: control target
= control target key end

     0   :  { %v998_v2 = vmov 0   ;;  %s1286_s0 = inlined_call_operand.vmem [shape: f32[8,128], index: 0, kind: input, shape index: {}]   ;;  %s1287_s1 = inlined_call_operand.vmem [shape: bf16[128,256], index: 1, kind: input, shape index: {}]   ;;  %s1288_s2 = inlined_call_operand.vmem [shape: f32[1,256], index: 2, kind: input, shape index: {}]   ;;  %s1289_s3 = inlined_call_operand.vmem [shape: bf16[256,256], index: 3, kind: input, shape index: {}]   ;;  %s1290_s4 = inlined_call_operand.vmem [shape: f32[1,256], index: 4, kind: input, shape index: {}]   ;;  %s1291_s5 = inlined_call_operand.vmem [shape: bf16[256,128], index: 5, kind: input, shape index: {}]   ;;  %s1292_s6 = inlined_call_operand.vmem [shape: f32[1,128], index: 6, kind: input, shape index: {}]   ;;  %s1293_s7 = inlined_call_operand.vmem [shape: bf16[128,128], index: 7, kind: input, shape index: {}]   ;;  %s1294_s8 = inlined_call_operand.vmem [shape: f32[1,128], index: 8, kind: input, shape index: {}]   ;;  %s1295_s9 = inlined_call_operand.hbm [shape: f32[8,128], index: 9, kind: output, shape index: {}]  }
   0x1   :  { %v880_v0 = vld [vmem:[%s1287_s1 + $0x74] ss:$8 sps:$4 sm:$0xff]   ;;  %v882_v1 = vld [vmem:[%s1287_s1 + $0x70] ss:$8 sps:$4 sm:$0xff]   ;;  %176 = vmatprep.mubr.bf16.mxu0 %v998_v2  ;;  %v883_v3 = vld [vmem:[%s1287_s1 + $0x64] ss:$8 sps:$4 sm:$0xff]  }
   0x2   :  { %144 = vmatprep.subr.bf16.mxu0 %v880_v0  ;;  %v885_v4 = vld [vmem:[%s1287_s1 + $0x60] ss:$8 sps:$4 sm:$0xff]   ;;  %v886_v5 = vld [vmem:[%s1287_s1 + $0x54] ss:$8 sps:$4 sm:$0xff]   ;;  %v888_v6 = vld [vmem:[%s1287_s1 + $0x50] ss:$8 sps:$4 sm:$0xff]  }
   0x3   :  { %145 = vmatpush1.bf16.msra.mxu0 %v882_v1  ;;  %v889_v7 = vld [vmem:[%s1287_s1 + $0x44] ss:$8 sps:$4 sm:$0xff]   ;;  %v891_v8 = vld [vmem:[%s1287_s1 + $0x40] ss:$8 sps:$4 sm:$0xff]   ;;  %v892_v9 = vld [vmem:[%s1287_s1 + $0x34] ss:$8 sps:$4 sm:$0xff]  }
   0x4   :  { %146 = vmatprep.subr.bf16.mxu0 %v883_v3  ;;  %v904_v10 = vld [vmem:[%s1289_s3 + $0x74] ss:$8 sps:$4 sm:$0xff]   ;;  %v906_v11 = vld [vmem:[%s1289_s3 + $0x70] ss:$8 sps:$4 sm:$0xff]   ;;  %v907_v12 = vld [vmem:[%s1289_s3 + $0x64] ss:$8 sps:$4 sm:$0xff]  }
   0x5   :  { %397 = vmatprep.subr.bf16.mxu1 %v904_v10  ;;  %v894_v13 = vld [vmem:[%s1287_s1 + $0x30] ss:$8 sps:$4 sm:$0xff]   ;;  %v909_v14 = vld [vmem:[%s1289_s3 + $0x60] ss:$8 sps:$4 sm:$0xff]   ;;  %v910_v15 = vld [vmem:[%s1289_s3 + $0x54] ss:$8 sps:$4 sm:$0xff]  }
   0x6   :  { %398 = vmatpush1.bf16.msra.mxu1 %v906_v11  ;;  %v895_v16 = vld [vmem:[%s1287_s1 + $0x24] ss:$8 sps:$4 sm:$0xff]   ;;  %v897_v17 = vld [vmem:[%s1287_s1 + $0x20] ss:$8 sps:$4 sm:$0xff]   ;;  %v912_v18 = vld [vmem:[%s1289_s3 + $0x50] ss:$8 sps:$4 sm:$0xff]  }
   0x7   :  { %147 = vmatpush1.bf16.msra.mxu0 %v885_v4  ;;  %399 = vmatprep.subr.bf16.mxu1 %v907_v12  ;;  %v913_v19 = vld [vmem:[%s1289_s3 + $0x44] ss:$8 sps:$4 sm:$0xff]   ;;  %v898_v20 = vld [vmem:[%s1287_s1 + $0x14] ss:$8 sps:$4 sm:$0xff]   ;;  %v900_v21 = vld [vmem:[%s1287_s1 + $0x10] ss:$8 sps:$4 sm:$0xff]  }
   0x8   :  { %148 = vmatprep.subr.bf16.mxu0 %v886_v5  ;;  %v915_v22 = vld [vmem:[%s1289_s3 + $0x40] ss:$8 sps:$4 sm:$0xff]   ;;  %v916_v23 = vld [vmem:[%s1289_s3 + $0x34] ss:$8 sps:$4 sm:$0xff]   ;;  %v901_v24 = vld [vmem:[%s1287_s1 + $0x4] ss:$8 sps:$4 sm:$0xff]  }
   0x9   :  { %v903_v25 = vld [vmem:[%s1287_s1] ss:$8 sps:$4 sm:$0xff]   ;;  %v918_v27 = vld [vmem:[%s1289_s3 + $0x30] ss:$8 sps:$4 sm:$0xff]   ;;  %v919_v28 = vld [vmem:[%s1289_s3 + $0x24] ss:$8 sps:$4 sm:$0xff]  }
   0xa   :  { %400 = vmatpush1.bf16.msra.mxu1 %v909_v14  ;;  %v34_v26 = vld [vmem:[%s1286_s0] sm:$0xff]  ;;  %v922_v30 = vld [vmem:[%s1289_s3 + $0x14] ss:$8 sps:$4 sm:$0xff]   ;;  %v924_v32 = vld [vmem:[%s1289_s3 + $0x10] ss:$8 sps:$4 sm:$0xff]  }
   0xb   :  { %149 = vmatpush1.bf16.msra.mxu0 %v888_v6  ;;  %401 = vmatprep.subr.bf16.mxu1 %v910_v15  ;;  %v921_v29 = vld [vmem:[%s1289_s3 + $0x20] ss:$8 sps:$4 sm:$0xff]   ;;  %v35_v31 = vpack.c.bf16 %v34_v26, %v34_v26  ;;  %v925_v33 = vld [vmem:[%s1289_s3 + $0x4] ss:$8 sps:$4 sm:$0xff]   ;;  %v928_v35 = vld [vmem:[%s1289_s3 + $0xf4] ss:$8 sps:$4 sm:$0xff]  }
   0xc   :  { %150 = vmatprep.subr.bf16.mxu0 %v889_v7  ;;  %v927_v34 = vld [vmem:[%s1289_s3] ss:$8 sps:$4 sm:$0xff]   ;;  %v930_v36 = vld [vmem:[%s1289_s3 + $0xf0] ss:$8 sps:$4 sm:$0xff]   ;;  %v931_v37 = vld [vmem:[%s1289_s3 + $0xe4] ss:$8 sps:$4 sm:$0xff]  }
   0xd   :  { %v933_v38 = vld [vmem:[%s1289_s3 + $0xe0] ss:$8 sps:$4 sm:$0xff]   ;;  %v934_v39 = vld [vmem:[%s1289_s3 + $0xd4] ss:$8 sps:$4 sm:$0xff]  }
   0xe   :  { %402 = vmatpush1.bf16.msra.mxu1 %v912_v18 }
   0xf   :  { %151 = vmatpush1.bf16.msra.mxu0 %v891_v8  ;;  %403 = vmatprep.subr.bf16.mxu1 %v913_v19 }
  0x10   :  { %152 = vmatprep.subr.bf16.mxu0 %v892_v9 }
  0x12   :  { %404 = vmatpush1.bf16.msra.mxu1 %v915_v22 }
  0x13   :  { %153 = vmatpush1.bf16.msra.mxu0 %v894_v13  ;;  %405 = vmatprep.subr.bf16.mxu1 %v916_v23 }
  0x14   :  { %154 = vmatprep.subr.bf16.mxu0 %v895_v16 }
  0x16   :  { %406 = vmatpush1.bf16.msra.mxu1 %v918_v27 }
  0x17   :  { %155 = vmatpush1.bf16.msra.mxu0 %v897_v17  ;;  %407 = vmatprep.subr.bf16.mxu1 %v919_v28 }
  0x18   :  { %156 = vmatprep.subr.bf16.mxu0 %v898_v20 }
  0x1a   :  { %408 = vmatpush1.bf16.msra.mxu1 %v921_v29 }
  0x1b   :  { %157 = vmatpush1.bf16.msra.mxu0 %v900_v21  ;;  %409 = vmatprep.subr.bf16.mxu1 %v922_v30 }
  0x1c   :  { %158 = vmatprep.subr.bf16.mxu0 %v901_v24 }
  0x1e   :  { %410 = vmatpush1.bf16.msra.mxu1 %v924_v32 }
  0x1f   :  { %159 = vmatpush1.bf16.msra.mxu0 %v903_v25  ;;  %411 = vmatprep.subr.bf16.mxu1 %v925_v33 }
  0x22   :  { %177 = vmatmul.mubr.bf16.vlgmr.msra.gmra.mxu0 %v35_v31  ;;  %412 = vmatpush1.bf16.msra.mxu1 %v927_v34 }
  0x23   :  { %413 = vmatprep.subr.bf16.mxu1 %v928_v35 }
  0x26   :  { %414 = vmatpush2.bf16.msra.mxu1 %v930_v36 }
  0x27   :  { %415 = vmatprep.subr.bf16.mxu1 %v931_v37 }
  0x28   :  { %14 = vsyncpa [#allocation3], 0  ;;  %v936_v40 = vld [vmem:[%s1289_s3 + $0xd0] ss:$8 sps:$4 sm:$0xff]   ;;  %v937_v41 = vld [vmem:[%s1289_s3 + $0xc4] ss:$8 sps:$4 sm:$0xff]   ;;  %v54_v62 = vlaneseq }
  0x29   :  { %v939_v42 = vld [vmem:[%s1289_s3 + $0xc0] ss:$8 sps:$4 sm:$0xff]   ;;  %v940_v43 = vld [vmem:[%s1289_s3 + $0xb4] ss:$8 sps:$4 sm:$0xff]   ;;  %v942_v44 = vld [vmem:[%s1289_s3 + $0xb0] ss:$8 sps:$4 sm:$0xff]  }
  0x2a   :  { %416 = vmatpush2.bf16.msra.mxu1 %v933_v38  ;;  %v943_v45 = vld [vmem:[%s1289_s3 + $0xa4] ss:$8 sps:$4 sm:$0xff]   ;;  %v945_v46 = vld [vmem:[%s1289_s3 + $0xa0] ss:$8 sps:$4 sm:$0xff]   ;;  %v946_v47 = vld [vmem:[%s1289_s3 + $0x94] ss:$8 sps:$4 sm:$0xff]  }
  0x2b   :  { %417 = vmatprep.subr.bf16.mxu1 %v934_v39  ;;  %v948_v48 = vld [vmem:[%s1289_s3 + $0x90] ss:$8 sps:$4 sm:$0xff]   ;;  %v949_v49 = vld [vmem:[%s1289_s3 + $0x84] ss:$8 sps:$4 sm:$0xff]   ;;  %v951_v50 = vld [vmem:[%s1289_s3 + $0x80] ss:$8 sps:$4 sm:$0xff]  }
  0x2c   :  { %v952_v51 = vld [vmem:[%s1291_s5 + $0x78] sm:$0xff]   ;;  %v954_v53 = vld [vmem:[%s1291_s5 + $0x70] sm:$0xff]   ;;  %v956_v55 = vld [vmem:[%s1291_s5 + $0x68] sm:$0xff]   ;;  %v55_v63 = vshrl.u32 %v54_v62, 7  ;;  %v999_v22 = vmov 0.0   ;;  %vm1000_vm4 = vmmov 0  }
  0x2d   :  { %v953_v52 = vld [vmem:[%s1291_s5 + $0x38] sm:$0xff]   ;;  %825 = vmatprep.subr.bf16.mxu0 %v952_v51  ;;  %v955_v54 = vld [vmem:[%s1291_s5 + $0x30] sm:$0xff]   ;;  %v957_v56 = vld [vmem:[%s1291_s5 + $0x28] sm:$0xff]   ;;  %s1001_s22 = smov [#allocation2]  }
  0x2e   :  { %418 = vmatpush2.bf16.msra.mxu1 %v936_v40  ;;  %826 = vmatpush3.bf16.msra.mxu0 %v953_v52  ;;  %v958_v57 = vld [vmem:[%s1291_s5 + $0x60] sm:$0xff]   ;;  %v960_v59 = vld [vmem:[%s1291_s5 + $0x58] sm:$0xff]   ;;  %v962_v61 = vld [vmem:[%s1291_s5 + $0x50] sm:$0xff]   ;;  %v56_v0 = vsub.s32 0, %v55_v63  ;;  %v60_v2 = vsub.s32 1, %v55_v63  ;;  %s743_s23 = sshll.u32 %s1001_s22, 4  ;;  %s744_s23 = int_to_ptr.vmem [resolvable:$true] %s743_s23 }
  0x2f   :  { %419 = vmatprep.subr.bf16.mxu1 %v937_v41  ;;  %827 = vmatprep.subr.bf16.mxu0 %v954_v53  ;;  %v959_v58 = vld [vmem:[%s1291_s5 + $0x20] sm:$0xff]   ;;  %v961_v60 = vld [vmem:[%s1291_s5 + $0x18] sm:$0xff]   ;;  %v963_v17 = vld [vmem:[%s1291_s5 + $0x10] sm:$0xff]   ;;  %p981_p1 = scmp.lt.s32.totalorder %s744_s23, %s744_s23 }
  0x30   :  { %v52_v1 = vld [vmem:[%s1288_s2] sm:$0x3]  ;;  %v964_v18 = vld [vmem:[%s1291_s5 + $0x48] sm:$0xff]   ;;  %v968_v37 = vld [vmem:[%s1293_s7 + $0x38] sm:$0xff]  }
  0x31   :  { %v57_v3 = vrot.slane %v52_v1, %v56_v0  ;;  %v61_v4 = vrot.slane %v52_v1, %v60_v2  ;;  %v965_v19 = vld [vmem:[%s1291_s5 + $0x8] sm:$0xff]   ;;  %v966_v20 = vld [vmem:[%s1291_s5 + $0x40] sm:$0xff]   ;;  %v969_v39 = vld [vmem:[%s1293_s7 + $0x30] sm:$0xff]  }
  0x32   :  { %420 = vmatpush2.bf16.msra.mxu1 %v939_v42  ;;  %828 = vmatpush3.bf16.msra.mxu0 %v955_v54  ;;  %v967_v21 = vld [vmem:[%s1291_s5] sm:$0xff]   ;;  %v970_v40 = vld [vmem:[%s1293_s7 + $0x28] sm:$0xff]   ;;  %v972_v42 = vld [vmem:[%s1293_s7 + $0x18] sm:$0xff]  }
  0x33   :  { %421 = vmatprep.subr.bf16.mxu1 %v940_v43  ;;  %829 = vmatprep.subr.bf16.mxu0 %v956_v55  ;;  %v225_v23 = vld [vmem:[%s1290_s4] sm:$0x3]  ;;  %v973_v43 = vld [vmem:[%s1293_s7 + $0x10] sm:$0xff]  }
  0x34   :  { %v230_v24 = vrot.slane %v225_v23, %v56_v0  ;;  %v234_v25 = vrot.slane %v225_v23, %v60_v2  ;;  %v971_v41 = vld [vmem:[%s1293_s7 + $0x20] sm:$0xff]  }
  0x36   :  { %422 = vmatpush2.bf16.msra.mxu1 %v942_v44  ;;  %830 = vmatpush3.bf16.msra.mxu0 %v957_v56  ;;  %v974_v44 = vld [vmem:[%s1293_s7 + $0x8] sm:$0xff]   ;;  %v816_v56 = vld [vmem:[%s1294_s8] ss:$0 sm:$0xff] }
  0x37   :  { %423 = vmatprep.subr.bf16.mxu1 %v943_v45  ;;  %831 = vmatprep.subr.bf16.mxu0 %v958_v57  ;;  %v975_v45 = vld [vmem:[%s1293_s7] sm:$0xff]  }
  0x3a   :  { %424 = vmatpush2.bf16.msra.mxu1 %v945_v46  ;;  %832 = vmatpush3.bf16.msra.mxu0 %v959_v58 }
  0x3b   :  { %425 = vmatprep.subr.bf16.mxu1 %v946_v47  ;;  %833 = vmatprep.subr.bf16.mxu0 %v960_v59  ;;  %v799_v47 = vld [vmem:[%s1292_s6] ss:$0 sm:$0xff]  ;;  %s976_s6 = scalar_lea.vmem %s744_s23, 128 }
  0x3c   :  { %p977_p0 = scmp.ne.s32.totalorder %s744_s23, %s976_s6  ;;  %p982_p2 = scmp.lt.s32.totalorder %s976_s6, %s976_s6 }
  0x3e   :  { %426 = vmatpush2.bf16.msra.mxu1 %v948_v48  ;;  %834 = vmatpush3.bf16.msra.mxu0 %v961_v60  ;;  %p983_p3 = por %p982_p2, %p981_p1 }
  0x3f   :  { %427 = vmatprep.subr.bf16.mxu1 %v949_v49  ;;  %835 = vmatprep.subr.bf16.mxu0 %v962_v61 }
  0x40   :  { %p984_p4 = pnand %p983_p3, %p977_p0 }
  0x42   :  { %428 = vmatpush2.bf16.msra.mxu1 %v951_v50  ;;  %836 = vmatpush3.bf16.msra.mxu0 %v963_v17 }
  0x43   :  { %837 = vmatprep.subr.bf16.mxu0 %v964_v18 }
  0x46   :  { %838 = vmatpush3.bf16.msra.mxu0 %v965_v19 }
  0x47   :  { %839 = vmatprep.subr.bf16.mxu0 %v966_v20 }
  0x4a   :  { %840 = vmatpush3.bf16.msra.mxu0 %v967_v21 }
  0x4b   :  { %856 = vmatprep.subr.bf16.mxu0 %v999_v22 }
  0xe2   :  { %v178_v5 = vpop.f32.mrf.mxu0 }
  0xe3   :  { %v179_v6 = vadd.f32 %v178_v5, %v57_v3 }
  0xe4   :  { %v180_v7 = vpop.f32.mrf.mxu0 }
  0xe5   :  { %vm185_vm0 = vcmp.ge.f32.partialorder %v179_v6, 0.0  ;;  %v187_v8 = vmul.f32 0.01, %v179_v6  ;;  %v181_v9 = vadd.f32 %v180_v7, %v61_v4 }
  0xe6   :  { %v182_v10 = vpop.f32.mrf.mxu0 }
  0xe7   :  { %vm186_vm1 = vcmp.ge.f32.partialorder %v181_v9, 0.0  ;;  %v188_v11 = vmul.f32 0.01, %v181_v9  ;;  %v189_v13 = vsel %vm185_vm0, %v179_v6, %v187_v8 }
  0xe8   :  { %v183_v12 = vpop.f32.mrf.mxu0  ;;  %v191_v16 = vpack.c.bf16 %v189_v13, %v189_v13 }
  0xe9   :  { %v190_v14 = vsel %vm186_vm1, %v181_v9, %v188_v11 }
  0xea   :  { %v192_v15 = vpack.c.bf16 %v190_v14, %v190_v14 }
  0xec   :  { %429 = vmatprep.mubr.bf16.mxu1 %v192_v15 }
  0xed   :  { %430 = vmatmul.mubr.bf16.vlgmr.msra.gmra.mxu1 %v191_v16 }
 0x1ad   :  { %v431_v26 = vpop.f32.mrf.mxu1 }
 0x1ae   :  { %v432_v27 = vadd.f32 %v431_v26, %v230_v24 }
 0x1af   :  { %v433_v28 = vpop.f32.mrf.mxu1 }
 0x1b0   :  { %vm438_vm2 = vcmp.ge.f32.partialorder %v432_v27, 0.0  ;;  %v440_v29 = vmul.f32 0.01, %v432_v27  ;;  %v434_v30 = vadd.f32 %v433_v28, %v234_v25 }
 0x1b1   :  { %v435_v31 = vpop.f32.mrf.mxu1 }
 0x1b2   :  { %vm439_vm3 = vcmp.ge.f32.partialorder %v434_v30, 0.0  ;;  %v441_v32 = vmul.f32 0.01, %v434_v30  ;;  %v442_v33 = vsel %vm438_vm2, %v432_v27, %v440_v29 }
 0x1b3   :  { %v436_v34 = vpop.f32.mrf.mxu1  ;;  %v444_v38 = vpack.c.bf16 %v442_v33, %v442_v33 }
 0x1b4   :  { %v443_v35 = vsel %vm439_vm3, %v434_v30, %v441_v32 }
 0x1b5   :  { %v445_v36 = vpack.c.bf16 %v443_v35, %v443_v35 }
 0x1b7   :  { %613 = vmatprep.mubr.bf16.mxu0 %v445_v36 }
 0x1b8   :  { %614 = vmatmul.mubr.bf16.vlgmr.msra.gmra.mxu0 %v444_v38 }
 0x1b9   :  { %857 = vmatpush3.bf16.msra.mxu0 %v968_v37  ;;  %872 = vmatprep.mubr.msk.bf16.mxu0 %vm1000_vm4, %v999_v22 }
 0x1ba   :  { %858 = vmatprep.subr.bf16.mxu0 %v999_v22 }
 0x1bd   :  { %859 = vmatpush3.bf16.msra.mxu0 %v969_v39 }
 0x1be   :  { %860 = vmatprep.subr.bf16.mxu0 %v999_v22 }
 0x1c1   :  { %861 = vmatpush3.bf16.msra.mxu0 %v970_v40 }
 0x1c2   :  { %862 = vmatprep.subr.bf16.mxu0 %v999_v22 }
 0x1c5   :  { %863 = vmatpush3.bf16.msra.mxu0 %v971_v41 }
 0x1c6   :  { %864 = vmatprep.subr.bf16.mxu0 %v999_v22 }
 0x1c9   :  { %865 = vmatpush3.bf16.msra.mxu0 %v972_v42 }
 0x1ca   :  { %866 = vmatprep.subr.bf16.mxu0 %v999_v22 }
 0x1cd   :  { %867 = vmatpush3.bf16.msra.mxu0 %v973_v43 }
 0x1ce   :  { %868 = vmatprep.subr.bf16.mxu0 %v999_v22 }
 0x1d1   :  { %869 = vmatpush3.bf16.msra.mxu0 %v974_v44 }
 0x1d2   :  { %870 = vmatprep.subr.bf16.mxu0 %v999_v22 }
 0x1d5   :  { %871 = vmatpush3.bf16.msra.mxu0 %v975_v45 }
 0x278   :  { %v841_v46 = vpop.f32.mrf.mxu0 }
 0x27a   :  { %v842_v48 = vpop.f32.mrf.mxu0 }
 0x27b   :  { %v843_v49 = vadd.f32 %v842_v48, %v841_v46 }
 0x27c   :  { %v844_v50 = vpop.f32.mrf.mxu0 }
 0x27d   :  { %v616_v51 = vadd.f32 %v843_v49, %v799_v47 }
 0x27e   :  { %v845_v52 = vpop.f32.mrf.mxu0 }
 0x27f   :  { %vm621_vm5 = vcmp.ge.f32.partialorder %v616_v51, 0.0  ;;  %v622_v53 = vmul.f32 0.02, %v616_v51 }
 0x281   :  { %v623_v54 = vsel %vm621_vm5, %v616_v51, %v622_v53 }
 0x282   :  { %v624_v55 = vpack.c.bf16 %v623_v54, %v623_v54 }
 0x284   :  { %873 = vmatmul.mubr.bf16.vlgmr.msra.gmra.mxu0 %v624_v55 }
 0x344   :  { %v730_v57 = vpop.f32.mrf.mxu0 }
 0x345   :  { %v731_v58 = vadd.f32 %v816_v56, %v730_v57 }
 0x346   :  { %v874_v59 = vpop.f32.mrf.mxu0 }
 0x347   :  { %736 = vst [vmem:[#allocation2] sm:$0xff] %v731_v58 }
 0x348   :  { %v733_v60 = vpop.f32.mrf.mxu0 }
 0x349   :  { %987 = shalt.err (!%p984_p4)
}
 0x34a   :  { %746 = dma.vmem_to_hbm [thread:$0]  %s744_s23, 128, %s1295_s9, [#allocation3]   ;;  %v875_v61 = vpop.f32.mrf.mxu0 }
 0x34b   :  { %996 = dma.done.wait [#allocation3], 128  }
 0x34c   :  { %997 = vsyncadd [#allocation3], 4294967168 }
 0x34d   :  { %750 = vsyncpa [#allocation3], 1 }

</bundles_post_ra>
